<compile_context>
chip_gen: v7x
topology: tpu7x:2x2x1
jax: 0.10.0
libtpu: 0.0.40
codegen_flags: <defaults>
</compile_context>

<pallas_src>
import jax
import jax.numpy as jnp
from jax import lax
from jax.experimental import pallas as pl
from jax.experimental.pallas import tpu as pltpu  # noqa: F401

# ----------------------------- config (small) -----------------------------
N_NODES = 16          # number of graph nodes
NUM_FEATURES = 8      # data.num_features
DIM = 32              # GeniePath dim
LSTM_HIDDEN = 32      # equals DIM so layers compose (as in the reference model)
NUM_CLASS = 4         # data.num_class
NUM_LAYERS = 2
CLASS_PAD = 128       # lane-dense classifier width (real classes sliced on host)

NEG_BIG = jnp.float32(1e30)


# ----------------------------- fused kernel --------------------------------
def genie_kernel(x_ref, neg_mask_ref, w1_ref, b1_ref,
                 gat_w_ref, att_dst_ref, att_src_ref, gat_b_ref,
                 lstm_w_ref, w2_ref, b2_ref,
                 embed_ref, logp_ref):
    n = x_ref.shape[0]
    H = LSTM_HIDDEN
    neg_mask = neg_mask_ref[...]                  # (N, N): 0 for edges/self-loops, -1e30 else

    # lin1: x = x @ W1 + b1
    x = jnp.dot(x_ref[...], w1_ref[...],
                preferred_element_type=jnp.float32) + b1_ref[...]

    h = jnp.zeros((n, H), jnp.float32)
    c = jnp.zeros((n, H), jnp.float32)

    for l in range(NUM_LAYERS):                   # static unroll (NUM_LAYERS = 2)
        # ---------- Breadth: GATConv (heads=1) dense masked softmax, then tanh ----------
        hp = jnp.dot(x, gat_w_ref[l], preferred_element_type=jnp.float32)   # (N, D)
        # dst score per node: VPU multiply + XLU row reduce (no 1-lane-output MXU op).
        a_dst = jnp.sum(hp * att_dst_ref[l], axis=-1, keepdims=True)        # (N, 1)
        # (1, N) src scores via trans-B dot_general -> no materialized hp.T transpose.
        a_src = lax.dot_general(att_src_ref[l], hp, (((1,), (1,)), ((), ())),
                                preferred_element_type=jnp.float32)         # (1, N)
        e = a_dst + a_src                         # e[i, j] = a_dst[i] + a_src[j]
        e = jnp.where(e > 0, e, 0.2 * e)          # LeakyReLU(negative_slope=0.2)
        e = e + neg_mask                          # additive mask: non-neighbors -> -1e30
        m = jnp.max(e, axis=-1, keepdims=True)
        p = jnp.exp(e - m)                        # masked entries underflow to exactly 0
        denom = jnp.sum(p, axis=-1, keepdims=True)    # self-loops guarantee > 0
        attn = p * pl.reciprocal(denom, approx=True)  # EUP reciprocal, not VALU divide
        xg = jnp.tanh(jnp.dot(attn, hp, preferred_element_type=jnp.float32)
                      + gat_b_ref[l])

        # ---------- Depth: single-step LSTM (seq_len=1, bias=False), fused gate GEMM ----------
        # One (N, D+H) @ (D+H, 4H) matmul; gate column order is (i, f, o, g) so one
        # sigmoid covers the first 3H lanes and one tanh covers the last H.
        xh = jnp.concatenate([xg, h], axis=-1)                                  # (N, D+H)
        gates = jnp.dot(xh, lstm_w_ref[l], preferred_element_type=jnp.float32)  # (N, 4H)
        sig = jax.nn.sigmoid(gates[:, :3 * H])                                  # lane-dense EUP block
        i_g = sig[:, 0 * H:1 * H]
        f_g = sig[:, 1 * H:2 * H]
        o_g = sig[:, 2 * H:3 * H]
        g_g = jnp.tanh(gates[:, 3 * H:4 * H])
        c = f_g * c + i_g * g_g
        h = o_g * jnp.tanh(c)
        x = h                                     # x = lstm output[0]

    embed_ref[...] = x

    # lin2 + log_softmax(dim=-1), computed over the lane-dense padded classifier.
    # Padded columns carry bias -1e30 -> contribute exp(~ -1e30) == 0 to the lse,
    # so the real-class log-probabilities are unchanged.
    logits = jnp.dot(x, w2_ref[...], preferred_element_type=jnp.float32) + b2_ref[...]
    mx = jnp.max(logits, axis=-1, keepdims=True)
    z = logits - mx
    lse = jnp.log(jnp.sum(jnp.exp(z), axis=-1, keepdims=True))
    logp_ref[...] = z - lse


# ----------------------------- host helpers ---------------------------------
def edge_index_to_neg_mask(edge_index, n):
    # adj[dst, src] = 1, plus self-loops (GATConv add_self_loops=True), then turned
    # into an additive mask: 0 where an edge exists, -1e30 elsewhere.
    adj = jnp.zeros((n, n), jnp.float32)
    adj = adj.at[edge_index[1], edge_index[0]].set(1.0)
    adj = jnp.maximum(adj, jnp.eye(n, dtype=jnp.float32))
    return (adj - 1.0) * NEG_BIG


def fuse_lstm_gates(w_ih_ifgo, w_hh_ifgo):
    # w_ih_ifgo: (4, D, H) per-gate input weights, PyTorch gate order (i, f, g, o),
    #            already transposed for x @ W (i.e. weight_ih_l0[g*H:(g+1)*H].T).
    # w_hh_ifgo: (4, H, H) per-gate hidden weights, same convention.
    # Returns (D + H, 4H): rows 0:D act on xg, rows D:D+H act on h; gate columns are
    # reordered to (i, f, o, g) so sigmoid / tanh each get one contiguous lane block.
    order = (0, 1, 3, 2)                                             # i, f, o, g
    w_x = jnp.concatenate([w_ih_ifgo[g] for g in order], axis=-1)    # (D, 4H)
    w_h = jnp.concatenate([w_hh_ifgo[g] for g in order], axis=-1)    # (H, 4H)
    return jnp.concatenate([w_x, w_h], axis=0)                       # (D+H, 4H)


@jax.jit
def genie_path_forward(x, edge_index, params):
    n = x.shape[0]
    neg_mask = edge_index_to_neg_mask(edge_index, n)
    # No grid: single invocation, full arrays resident in VMEM (everything is tiny).
    embed, logp_pad = pl.pallas_call(
        genie_kernel,
        out_shape=(jax.ShapeDtypeStruct((n, DIM), jnp.float32),
                   jax.ShapeDtypeStruct((n, CLASS_PAD), jnp.float32)),
    )(x, neg_mask,
      params["w1"], params["b1"],
      params["gat_w"], params["gat_att_dst"], params["gat_att_src"], params["gat_b"],
      params["lstm_w"],
      params["w2_pad"], params["b2_pad"])
    return embed, logp_pad[:, :NUM_CLASS]


def init_params(key):
    ks = jax.random.split(key, 9)
    s = 0.1
    L, D, H, C = NUM_LAYERS, DIM, LSTM_HIDDEN, NUM_CLASS

    # Classifier, padded to a lane-dense 128-wide output; padded bias = -1e30 so the
    # padded columns never influence the log_softmax over the real classes.
    w2 = s * jax.random.normal(ks[2], (D, C), jnp.float32)
    b2 = s * jax.random.normal(ks[3], (1, C), jnp.float32)
    w2_pad = jnp.zeros((D, CLASS_PAD), jnp.float32).at[:, :C].set(w2)
    b2_pad = jnp.full((1, CLASS_PAD), -NEG_BIG, jnp.float32).at[:, :C].set(b2)

    # LSTM (bias=False) weights, per-gate (i, f, g, o), transposed for x @ W, then
    # fused per layer into one (D+H, 4H) block with gate columns (i, f, o, g).
    w_ih = s * jax.random.normal(ks[7], (L, 4, D, H), jnp.float32)
    w_hh = s * jax.random.normal(ks[8], (L, 4, H, H), jnp.float32)
    lstm_w = jnp.stack([fuse_lstm_gates(w_ih[l], w_hh[l]) for l in range(L)], axis=0)

    return {
        "w1": s * jax.random.normal(ks[0], (NUM_FEATURES, D), jnp.float32),
        "b1": s * jax.random.normal(ks[1], (1, D), jnp.float32),
        "w2_pad": w2_pad,
        "b2_pad": b2_pad,
        # Per-layer GATConv params (heads=1). Both attention vectors stored as rows.
        "gat_w": s * jax.random.normal(ks[4], (L, D, D), jnp.float32),
        "gat_att_dst": s * jax.random.normal(ks[5], (L, 1, D), jnp.float32),
        "gat_att_src": s * jax.random.normal(ks[6], (L, 1, D), jnp.float32),
        "gat_b": jnp.zeros((L, 1, D), jnp.float32),
        "lstm_w": lstm_w,                                   # (L, D+H, 4H)
    }


# ----------------------------- main ----------------------------------------
if __name__ == "__main__":
    key = jax.random.PRNGKey(0)
    k_x, k_p = jax.random.split(key)

    x = jax.random.normal(k_x, (N_NODES, NUM_FEATURES), jnp.float32)

    # Deterministic ring graph, bidirectional edges ([2, E] COO like torch_geometric).
    src = jnp.arange(N_NODES, dtype=jnp.int32)
    dst = (src + 1) % N_NODES
    edge_index = jnp.stack(
        [jnp.concatenate([src, dst]), jnp.concatenate([dst, src])], axis=0
    )  # (2, 2N)

    params = init_params(k_p)

    embed, logp = genie_path_forward(x, edge_index, params)
    embed = jax.block_until_ready(embed)
    logp = jax.block_until_ready(logp)

    assert embed.shape == (N_NODES, DIM)
    assert logp.shape == (N_NODES, NUM_CLASS)
    # log_softmax rows should exponentiate-and-sum to ~1
    assert bool(jnp.allclose(jnp.sum(jnp.exp(logp), axis=-1), 1.0, atol=1e-4))
    assert bool(jnp.all(jnp.isfinite(embed))) and bool(jnp.all(jnp.isfinite(logp)))
    print("KERNEL_OK")
</pallas_src>

<mosaic_0001>
module attributes {stable_mosaic.version = 11 : i64} {
  func.func @genie_kernel(%arg0: memref<16x8xf32, #tpu.memory_space<vmem>>, %arg1: memref<16x16xf32, #tpu.memory_space<vmem>>, %arg2: memref<8x32xf32, #tpu.memory_space<vmem>>, %arg3: memref<1x32xf32, #tpu.memory_space<vmem>>, %arg4: memref<2x32x32xf32, #tpu.memory_space<vmem>>, %arg5: memref<2x1x32xf32, #tpu.memory_space<vmem>>, %arg6: memref<2x1x32xf32, #tpu.memory_space<vmem>>, %arg7: memref<2x1x32xf32, #tpu.memory_space<vmem>>, %arg8: memref<2x64x128xf32, #tpu.memory_space<vmem>>, %arg9: memref<32x128xf32, #tpu.memory_space<vmem>>, %arg10: memref<1x128xf32, #tpu.memory_space<vmem>>, %arg11: memref<16x32xf32, #tpu.memory_space<vmem>>, %arg12: memref<16x128xf32, #tpu.memory_space<vmem>>) attributes {dimension_semantics = [], scalar_prefetch = 0 : i64, scratch_operands = 0 : i64, tpu.core_type = #tpu.core_type<tc>} {
    %c0 = arith.constant 0 : index
    %c0_0 = arith.constant 0 : index
    %0 = vector.load %arg1[%c0, %c0_0] : memref<16x16xf32, #tpu.memory_space<vmem>>, vector<16x16xf32>
    %c0_1 = arith.constant 0 : index
    %c0_2 = arith.constant 0 : index
    %1 = vector.load %arg0[%c0_1, %c0_2] : memref<16x8xf32, #tpu.memory_space<vmem>>, vector<16x8xf32>
    %c0_3 = arith.constant 0 : index
    %c0_4 = arith.constant 0 : index
    %2 = vector.load %arg2[%c0_3, %c0_4] : memref<8x32xf32, #tpu.memory_space<vmem>>, vector<8x32xf32>
    %cst = arith.constant dense<0.000000e+00> : vector<16x32xf32>
    %3 = tpu.matmul %1, %2, %cst {dimension_numbers = #tpu.dot_dimension_numbers<[1], [0], [0], [1], [0, 0, 1, 1], [], []>} : vector<16x8xf32>, vector<8x32xf32>, vector<16x32xf32> -> vector<16x32xf32>
    %c0_5 = arith.constant 0 : index
    %c0_6 = arith.constant 0 : index
    %4 = vector.load %arg3[%c0_5, %c0_6] : memref<1x32xf32, #tpu.memory_space<vmem>>, vector<1x32xf32>
    %5 = vector.broadcast %4 : vector<1x32xf32> to vector<16x32xf32>
    %6 = arith.addf %3, %5 : vector<16x32xf32>
    %cst_7 = arith.constant 0.000000e+00 : f32
    %7 = vector.broadcast %cst_7 : f32 to vector<16x32xf32>
    %cst_8 = arith.constant 0.000000e+00 : f32
    %8 = vector.broadcast %cst_8 : f32 to vector<16x32xf32>
    %c0_9 = arith.constant 0 : index
    %c0_10 = arith.constant 0 : index
    %c0_11 = arith.constant 0 : index
    %9 = vector.load %arg4[%c0_9, %c0_10, %c0_11] : memref<2x32x32xf32, #tpu.memory_space<vmem>>, vector<1x32x32xf32>
    %10 = vector.shape_cast %9 : vector<1x32x32xf32> to vector<32x32xf32>
    %cst_12 = arith.constant dense<0.000000e+00> : vector<16x32xf32>
    %11 = tpu.matmul %6, %10, %cst_12 {dimension_numbers = #tpu.dot_dimension_numbers<[1], [0], [0], [1], [0, 0, 1, 1], [], []>} : vector<16x32xf32>, vector<32x32xf32>, vector<16x32xf32> -> vector<16x32xf32>
    %c0_13 = arith.constant 0 : index
    %c0_14 = arith.constant 0 : index
    %c0_15 = arith.constant 0 : index
    %12 = vector.load %arg5[%c0_13, %c0_14, %c0_15] : memref<2x1x32xf32, #tpu.memory_space<vmem>>, vector<1x1x32xf32>
    %13 = vector.shape_cast %12 : vector<1x1x32xf32> to vector<1x32xf32>
    %14 = vector.broadcast %13 : vector<1x32xf32> to vector<16x32xf32>
    %15 = arith.mulf %11, %14 : vector<16x32xf32>
    %cst_16 = arith.constant dense<0.000000e+00> : vector<16xf32>
    %16 = vector.multi_reduction <add>, %15, %cst_16 [1] : vector<16x32xf32> to vector<16xf32>
    %17 = vector.shape_cast %16 : vector<16xf32> to vector<16x1xf32>
    %c0_17 = arith.constant 0 : index
    %c0_18 = arith.constant 0 : index
    %c0_19 = arith.constant 0 : index
    %18 = vector.load %arg6[%c0_17, %c0_18, %c0_19] : memref<2x1x32xf32, #tpu.memory_space<vmem>>, vector<1x1x32xf32>
    %19 = vector.shape_cast %18 : vector<1x1x32xf32> to vector<1x32xf32>
    %cst_20 = arith.constant dense<0.000000e+00> : vector<1x16xf32>
    %20 = tpu.matmul %19, %11, %cst_20 {dimension_numbers = #tpu.dot_dimension_numbers<[1], [1], [0], [0], [0, 0, 1, 0], [], []>} : vector<1x32xf32>, vector<16x32xf32>, vector<1x16xf32> -> vector<1x16xf32>
    %21 = vector.broadcast %17 : vector<16x1xf32> to vector<16x16xf32>
    %22 = vector.broadcast %20 : vector<1x16xf32> to vector<16x16xf32>
    %23 = arith.addf %21, %22 : vector<16x16xf32>
    %cst_21 = arith.constant 0.000000e+00 : f32
    %24 = vector.broadcast %cst_21 : f32 to vector<16x16xf32>
    %25 = arith.cmpf ogt, %23, %24 : vector<16x16xf32>
    %cst_22 = arith.constant 2.000000e-01 : f32
    %26 = vector.broadcast %cst_22 : f32 to vector<16x16xf32>
    %27 = arith.mulf %26, %23 : vector<16x16xf32>
    %28 = arith.select %25, %23, %27 : vector<16x16xi1>, vector<16x16xf32>
    %29 = arith.addf %28, %0 : vector<16x16xf32>
    %cst_23 = arith.constant dense<0xFF800000> : vector<16xf32>
    %30 = vector.multi_reduction <maximumf>, %29, %cst_23 [1] : vector<16x16xf32> to vector<16xf32>
    %31 = vector.shape_cast %30 : vector<16xf32> to vector<16x1xf32>
    %32 = vector.broadcast %31 : vector<16x1xf32> to vector<16x16xf32>
    %33 = arith.subf %29, %32 : vector<16x16xf32>
    %34 = math.exp %33 : vector<16x16xf32>
    %cst_24 = arith.constant dense<0.000000e+00> : vector<16xf32>
    %35 = vector.multi_reduction <add>, %34, %cst_24 [1] : vector<16x16xf32> to vector<16xf32>
    %36 = vector.shape_cast %35 : vector<16xf32> to vector<16x1xf32>
    %37 = tpu.reciprocal %36 {approx = true} : vector<16x1xf32> -> vector<16x1xf32>
    %38 = vector.broadcast %37 : vector<16x1xf32> to vector<16x16xf32>
    %39 = arith.mulf %34, %38 : vector<16x16xf32>
    %cst_25 = arith.constant dense<0.000000e+00> : vector<16x32xf32>
    %40 = tpu.matmul %39, %11, %cst_25 {dimension_numbers = #tpu.dot_dimension_numbers<[1], [0], [0], [1], [0, 0, 1, 1], [], []>} : vector<16x16xf32>, vector<16x32xf32>, vector<16x32xf32> -> vector<16x32xf32>
    %c0_26 = arith.constant 0 : index
    %c0_27 = arith.constant 0 : index
    %c0_28 = arith.constant 0 : index
    %41 = vector.load %arg7[%c0_26, %c0_27, %c0_28] : memref<2x1x32xf32, #tpu.memory_space<vmem>>, vector<1x1x32xf32>
    %42 = vector.shape_cast %41 : vector<1x1x32xf32> to vector<1x32xf32>
    %43 = vector.broadcast %42 : vector<1x32xf32> to vector<16x32xf32>
    %44 = arith.addf %40, %43 : vector<16x32xf32>
    %45 = math.tanh %44 : vector<16x32xf32>
    %46 = tpu.concatenate %45, %7 in 1 : vector<16x32xf32>, vector<16x32xf32> -> vector<16x64xf32>
    %c0_29 = arith.constant 0 : index
    %c0_30 = arith.constant 0 : index
    %c0_31 = arith.constant 0 : index
    %47 = vector.load %arg8[%c0_29, %c0_30, %c0_31] : memref<2x64x128xf32, #tpu.memory_space<vmem>>, vector<1x64x128xf32>
    %48 = vector.shape_cast %47 : vector<1x64x128xf32> to vector<64x128xf32>
    %cst_32 = arith.constant dense<0.000000e+00> : vector<16x128xf32>
    %49 = tpu.matmul %46, %48, %cst_32 {dimension_numbers = #tpu.dot_dimension_numbers<[1], [0], [0], [1], [0, 0, 1, 1], [], []>} : vector<16x64xf32>, vector<64x128xf32>, vector<16x128xf32> -> vector<16x128xf32>
    %50 = vector.extract_strided_slice %49 {offsets = [0, 0], sizes = [16, 96], strides = [1, 1]} : vector<16x128xf32> to vector<16x96xf32>
    %51 = arith.negf %50 : vector<16x96xf32>
    %52 = math.exp %51 : vector<16x96xf32>
    %cst_33 = arith.constant 1.000000e+00 : f32
    %53 = vector.broadcast %cst_33 : f32 to vector<16x96xf32>
    %54 = arith.addf %53, %52 : vector<16x96xf32>
    %55 = arith.divf %53, %54 : vector<16x96xf32>
    %56 = vector.extract_strided_slice %55 {offsets = [0, 0], sizes = [16, 32], strides = [1, 1]} : vector<16x96xf32> to vector<16x32xf32>
    %57 = vector.extract_strided_slice %55 {offsets = [0, 32], sizes = [16, 32], strides = [1, 1]} : vector<16x96xf32> to vector<16x32xf32>
    %58 = vector.extract_strided_slice %55 {offsets = [0, 64], sizes = [16, 32], strides = [1, 1]} : vector<16x96xf32> to vector<16x32xf32>
    %59 = vector.extract_strided_slice %49 {offsets = [0, 96], sizes = [16, 32], strides = [1, 1]} : vector<16x128xf32> to vector<16x32xf32>
    %60 = math.tanh %59 : vector<16x32xf32>
    %61 = arith.mulf %57, %8 : vector<16x32xf32>
    %62 = arith.mulf %56, %60 : vector<16x32xf32>
    %63 = arith.addf %61, %62 : vector<16x32xf32>
    %64 = math.tanh %63 : vector<16x32xf32>
    %65 = arith.mulf %58, %64 : vector<16x32xf32>
    %c1 = arith.constant 1 : index
    %c0_34 = arith.constant 0 : index
    %c0_35 = arith.constant 0 : index
    %66 = vector.load %arg4[%c1, %c0_34, %c0_35] : memref<2x32x32xf32, #tpu.memory_space<vmem>>, vector<1x32x32xf32>
    %67 = vector.shape_cast %66 : vector<1x32x32xf32> to vector<32x32xf32>
    %cst_36 = arith.constant dense<0.000000e+00> : vector<16x32xf32>
    %68 = tpu.matmul %65, %67, %cst_36 {dimension_numbers = #tpu.dot_dimension_numbers<[1], [0], [0], [1], [0, 0, 1, 1], [], []>} : vector<16x32xf32>, vector<32x32xf32>, vector<16x32xf32> -> vector<16x32xf32>
    %c1_37 = arith.constant 1 : index
    %c0_38 = arith.constant 0 : index
    %c0_39 = arith.constant 0 : index
    %69 = vector.load %arg5[%c1_37, %c0_38, %c0_39] : memref<2x1x32xf32, #tpu.memory_space<vmem>>, vector<1x1x32xf32>
    %70 = vector.shape_cast %69 : vector<1x1x32xf32> to vector<1x32xf32>
    %71 = vector.broadcast %70 : vector<1x32xf32> to vector<16x32xf32>
    %72 = arith.mulf %68, %71 : vector<16x32xf32>
    %cst_40 = arith.constant dense<0.000000e+00> : vector<16xf32>
    %73 = vector.multi_reduction <add>, %72, %cst_40 [1] : vector<16x32xf32> to vector<16xf32>
    %74 = vector.shape_cast %73 : vector<16xf32> to vector<16x1xf32>
    %c1_41 = arith.constant 1 : index
    %c0_42 = arith.constant 0 : index
    %c0_43 = arith.constant 0 : index
    %75 = vector.load %arg6[%c1_41, %c0_42, %c0_43] : memref<2x1x32xf32, #tpu.memory_space<vmem>>, vector<1x1x32xf32>
    %76 = vector.shape_cast %75 : vector<1x1x32xf32> to vector<1x32xf32>
    %cst_44 = arith.constant dense<0.000000e+00> : vector<1x16xf32>
    %77 = tpu.matmul %76, %68, %cst_44 {dimension_numbers = #tpu.dot_dimension_numbers<[1], [1], [0], [0], [0, 0, 1, 0], [], []>} : vector<1x32xf32>, vector<16x32xf32>, vector<1x16xf32> -> vector<1x16xf32>
    %78 = vector.broadcast %74 : vector<16x1xf32> to vector<16x16xf32>
    %79 = vector.broadcast %77 : vector<1x16xf32> to vector<16x16xf32>
    %80 = arith.addf %78, %79 : vector<16x16xf32>
    %cst_45 = arith.constant 0.000000e+00 : f32
    %81 = vector.broadcast %cst_45 : f32 to vector<16x16xf32>
    %82 = arith.cmpf ogt, %80, %81 : vector<16x16xf32>
    %cst_46 = arith.constant 2.000000e-01 : f32
    %83 = vector.broadcast %cst_46 : f32 to vector<16x16xf32>
    %84 = arith.mulf %83, %80 : vector<16x16xf32>
    %85 = arith.select %82, %80, %84 : vector<16x16xi1>, vector<16x16xf32>
    %86 = arith.addf %85, %0 : vector<16x16xf32>
    %cst_47 = arith.constant dense<0xFF800000> : vector<16xf32>
    %87 = vector.multi_reduction <maximumf>, %86, %cst_47 [1] : vector<16x16xf32> to vector<16xf32>
    %88 = vector.shape_cast %87 : vector<16xf32> to vector<16x1xf32>
    %89 = vector.broadcast %88 : vector<16x1xf32> to vector<16x16xf32>
    %90 = arith.subf %86, %89 : vector<16x16xf32>
    %91 = math.exp %90 : vector<16x16xf32>
    %cst_48 = arith.constant dense<0.000000e+00> : vector<16xf32>
    %92 = vector.multi_reduction <add>, %91, %cst_48 [1] : vector<16x16xf32> to vector<16xf32>
    %93 = vector.shape_cast %92 : vector<16xf32> to vector<16x1xf32>
    %94 = tpu.reciprocal %93 {approx = true} : vector<16x1xf32> -> vector<16x1xf32>
    %95 = vector.broadcast %94 : vector<16x1xf32> to vector<16x16xf32>
    %96 = arith.mulf %91, %95 : vector<16x16xf32>
    %cst_49 = arith.constant dense<0.000000e+00> : vector<16x32xf32>
    %97 = tpu.matmul %96, %68, %cst_49 {dimension_numbers = #tpu.dot_dimension_numbers<[1], [0], [0], [1], [0, 0, 1, 1], [], []>} : vector<16x16xf32>, vector<16x32xf32>, vector<16x32xf32> -> vector<16x32xf32>
    %c1_50 = arith.constant 1 : index
    %c0_51 = arith.constant 0 : index
    %c0_52 = arith.constant 0 : index
    %98 = vector.load %arg7[%c1_50, %c0_51, %c0_52] : memref<2x1x32xf32, #tpu.memory_space<vmem>>, vector<1x1x32xf32>
    %99 = vector.shape_cast %98 : vector<1x1x32xf32> to vector<1x32xf32>
    %100 = vector.broadcast %99 : vector<1x32xf32> to vector<16x32xf32>
    %101 = arith.addf %97, %100 : vector<16x32xf32>
    %102 = math.tanh %101 : vector<16x32xf32>
    %103 = tpu.concatenate %102, %65 in 1 : vector<16x32xf32>, vector<16x32xf32> -> vector<16x64xf32>
    %c1_53 = arith.constant 1 : index
    %c0_54 = arith.constant 0 : index
    %c0_55 = arith.constant 0 : index
    %104 = vector.load %arg8[%c1_53, %c0_54, %c0_55] : memref<2x64x128xf32, #tpu.memory_space<vmem>>, vector<1x64x128xf32>
    %105 = vector.shape_cast %104 : vector<1x64x128xf32> to vector<64x128xf32>
    %cst_56 = arith.constant dense<0.000000e+00> : vector<16x128xf32>
    %106 = tpu.matmul %103, %105, %cst_56 {dimension_numbers = #tpu.dot_dimension_numbers<[1], [0], [0], [1], [0, 0, 1, 1], [], []>} : vector<16x64xf32>, vector<64x128xf32>, vector<16x128xf32> -> vector<16x128xf32>
    %107 = vector.extract_strided_slice %106 {offsets = [0, 0], sizes = [16, 96], strides = [1, 1]} : vector<16x128xf32> to vector<16x96xf32>
    %108 = arith.negf %107 : vector<16x96xf32>
    %109 = math.exp %108 : vector<16x96xf32>
    %cst_57 = arith.constant 1.000000e+00 : f32
    %110 = vector.broadcast %cst_57 : f32 to vector<16x96xf32>
    %111 = arith.addf %110, %109 : vector<16x96xf32>
    %112 = arith.divf %110, %111 : vector<16x96xf32>
    %113 = vector.extract_strided_slice %112 {offsets = [0, 0], sizes = [16, 32], strides = [1, 1]} : vector<16x96xf32> to vector<16x32xf32>
    %114 = vector.extract_strided_slice %112 {offsets = [0, 32], sizes = [16, 32], strides = [1, 1]} : vector<16x96xf32> to vector<16x32xf32>
    %115 = vector.extract_strided_slice %112 {offsets = [0, 64], sizes = [16, 32], strides = [1, 1]} : vector<16x96xf32> to vector<16x32xf32>
    %116 = vector.extract_strided_slice %106 {offsets = [0, 96], sizes = [16, 32], strides = [1, 1]} : vector<16x128xf32> to vector<16x32xf32>
    %117 = math.tanh %116 : vector<16x32xf32>
    %118 = arith.mulf %114, %63 : vector<16x32xf32>
    %119 = arith.mulf %113, %117 : vector<16x32xf32>
    %120 = arith.addf %118, %119 : vector<16x32xf32>
    %121 = math.tanh %120 : vector<16x32xf32>
    %122 = arith.mulf %115, %121 : vector<16x32xf32>
    %c0_58 = arith.constant 0 : index
    %c0_59 = arith.constant 0 : index
    %123 = vector.load %arg11[%c0_58, %c0_59] : memref<16x32xf32, #tpu.memory_space<vmem>>, vector<16x32xf32>
    tpu.vector_store %arg11[%c0_58, %c0_59], %122 {strides = array<i32>} : memref<16x32xf32, #tpu.memory_space<vmem>>, vector<16x32xf32>,
    %c0_60 = arith.constant 0 : index
    %c0_61 = arith.constant 0 : index
    %124 = vector.load %arg9[%c0_60, %c0_61] : memref<32x128xf32, #tpu.memory_space<vmem>>, vector<32x128xf32>
    %cst_62 = arith.constant dense<0.000000e+00> : vector<16x128xf32>
    %125 = tpu.matmul %122, %124, %cst_62 {dimension_numbers = #tpu.dot_dimension_numbers<[1], [0], [0], [1], [0, 0, 1, 1], [], []>} : vector<16x32xf32>, vector<32x128xf32>, vector<16x128xf32> -> vector<16x128xf32>
    %c0_63 = arith.constant 0 : index
    %c0_64 = arith.constant 0 : index
    %126 = vector.load %arg10[%c0_63, %c0_64] : memref<1x128xf32, #tpu.memory_space<vmem>>, vector<1x128xf32>
    %127 = vector.broadcast %126 : vector<1x128xf32> to vector<16x128xf32>
    %128 = arith.addf %125, %127 : vector<16x128xf32>
    %cst_65 = arith.constant dense<0xFF800000> : vector<16xf32>
    %129 = vector.multi_reduction <maximumf>, %128, %cst_65 [1] : vector<16x128xf32> to vector<16xf32>
    %130 = vector.shape_cast %129 : vector<16xf32> to vector<16x1xf32>
    %131 = vector.broadcast %130 : vector<16x1xf32> to vector<16x128xf32>
    %132 = arith.subf %128, %131 : vector<16x128xf32>
    %133 = math.exp %132 : vector<16x128xf32>
    %cst_66 = arith.constant dense<0.000000e+00> : vector<16xf32>
    %134 = vector.multi_reduction <add>, %133, %cst_66 [1] : vector<16x128xf32> to vector<16xf32>
    %135 = vector.shape_cast %134 : vector<16xf32> to vector<16x1xf32>
    %136 = math.log %135 : vector<16x1xf32>
    %137 = vector.broadcast %136 : vector<16x1xf32> to vector<16x128xf32>
    %138 = arith.subf %132, %137 : vector<16x128xf32>
    %c0_67 = arith.constant 0 : index
    %c0_68 = arith.constant 0 : index
    %139 = vector.load %arg12[%c0_67, %c0_68] : memref<16x128xf32, #tpu.memory_space<vmem>>, vector<16x128xf32>
    tpu.vector_store %arg12[%c0_67, %c0_68], %138 {strides = array<i32>} : memref<16x128xf32, #tpu.memory_space<vmem>>, vector<16x128xf32>,
    return
  }
}

</mosaic_0001>

<bundles_post_ra>
// kernel: genie_path_forward.1
= control target key start
LH: loop header
LB: loop body
LE: loop exit
PB: predicated region body
PF: predicated region fallthrough
CT: control target
= control target key end

     0   :  { %vm53_vm0 = vcmask 64512   ;;  %s1864_s0 = inlined_call_operand.vmem [shape: f32[16,8], index: 0, kind: input, shape index: {}]   ;;  %s1865_s1 = inlined_call_operand.vmem [shape: f32[16,16], index: 1, kind: input, shape index: {}]   ;;  %s1866_s2 = inlined_call_operand.vmem [shape: f32[8,32], index: 2, kind: input, shape index: {}]   ;;  %s1867_s3 = inlined_call_operand.vmem [shape: f32[1,32], index: 3, kind: input, shape index: {}]   ;;  %s1868_s4 = inlined_call_operand.vmem [shape: f32[2,32,32], index: 4, kind: input, shape index: {}]   ;;  %s1869_s5 = inlined_call_operand.vmem [shape: f32[2,1,32], index: 5, kind: input, shape index: {}]   ;;  %s1870_s6 = inlined_call_operand.vmem [shape: f32[2,1,32], index: 6, kind: input, shape index: {}]   ;;  %s1871_s7 = inlined_call_operand.vmem [shape: f32[2,1,32], index: 7, kind: input, shape index: {}]   ;;  %s1872_s8 = inlined_call_operand.vmem [shape: f32[2,64,128], index: 8, kind: input, shape index: {}]   ;;  %s1873_s9 = inlined_call_operand.vmem [shape: f32[32,128], index: 9, kind: input, shape index: {}]   ;;  %s1874_s10 = inlined_call_operand.vmem [shape: f32[1,128], index: 10, kind: input, shape index: {}]   ;;  %s1875_s11 = inlined_call_operand.hbm [shape: f32[16,32], index: 11, kind: output, shape index: {0}]   ;;  %s1876_s12 = inlined_call_operand.vmem [shape: f32[16,128], index: 12, kind: output, shape index: {1}]  }
   0x1   :  { %v45_v0 = vld [vmem:[%s1866_s2] sm:$0xff]  ;;  %v44_v2 = vld [vmem:[%s1864_s0 + $0x8] sm:$0xff] }
   0x2   :  { %v43_v1 = vld [vmem:[%s1864_s0] sm:$0xff]  ;;  %1287 = vmatprep.subr.mxu0 %v45_v0  ;;  %v136_v4 = vld [vmem:[%s1868_s4 + $0x8] sm:$0xff] }
   0x3   :  { %1289 = vmatprep.mubr.msk.f32.mxu0 %vm53_vm0, %v43_v1  ;;  %v135_v3 = vld [vmem:[%s1868_s4] sm:$0xff] }
   0x4   :  { %18 = vsyncpa [#allocation3], 0  ;;  %1288 = vmatpush3.msra.mxu0 %v45_v0  ;;  %v1391_v5 = vpack.c.bf16 %v136_v4, %v135_v3  ;;  %v137_v6 = vld [vmem:[%s1868_s4 + $0x10] sm:$0xff]  ;;  %v138_v7 = vld [vmem:[%s1868_s4 + $0x18] sm:$0xff]  ;;  %vm139_vm1 = vcmask 261120   ;;  %v1560_v14 = vmov 0.0|0.0   ;;  %v316_v26 = vlaneseq }
   0x5   :  { %1290 = vmatmul.mubr.msk.f32.vlgmr.msra.gmra.mrb[0].mxu0 %vm53_vm0, %v44_v2  ;;  %v1395_v8 = vpack.c.bf16 %v138_v7, %v137_v6  ;;  %v1185_v9 = vld [vmem:[%s1867_s3] ss:$0 sm:$0xff]  ;;  %1399 = vmatprep.subr.bf16.mxu0 %v1560_v14  ;;  %vm1561_vm2 = vmmov 0   ;;  %v1562_v15 = vmov 0.0   ;;  %vm1668_vm3 = vmpackc.low %vm139_vm1, %vm139_vm1  ;;  %vm330_vm6 = vcmask 130048   ;;  %v1693_v40 = vld [vmem:[%s1865_s1 + $0x8] sm:$0xff] }
   0x6   :  { %1392 = vmatprep.subr.bf16.mxu1 %v1391_v5  ;;  %1307 = vmatprep.mubr.msk.f32.mxu0 %vm1561_vm2, %v1562_v15  ;;  %v1190_v16 = vld [vmem:[%s1869_s5] ss:$0 sm:$0xff]  ;;  %v1680_v27 = vshrl.u32 %v316_v26, 7  ;;  %v446_v63 = vld [vmem:[%s1872_s8 + $0x8] sm:$0xff]  ;;  %v447_v1 = vld [vmem:[%s1872_s8 + $0x10] sm:$0xff]  ;;  %vm453_vm7 = vcmask 523264  }
   0x7   :  { %1394 = vmatpush3.bf16.msra.mxu1 %v1391_v5  ;;  %v236_v25 = vld [vmem:[%s1870_s6] sm:$0x1]  ;;  %v448_v2 = vld [vmem:[%s1872_s8 + $0x18] sm:$0xff]  ;;  %v450_v5 = vld [vmem:[%s1872_s8 + $0x28] sm:$0xff]  ;;  %s1563_s20 = smov 32   ;;  %s1564_s28 = smov 64  }
   0x8   :  { %1396 = vmatprep.subr.bf16.mxu1 %v1395_v8  ;;  %v318_v29 = vsub.s32 0, %v1680_v27  ;;  %v1688_v36 = vld [vmem:[%s1865_s1] sm:$0xff]  ;;  %v1411_v3 = vpack.c.bf16 %v448_v2, %v447_v1  ;;  %v451_v6 = vld [vmem:[%s1872_s8 + $0x30] sm:$0xff] }
   0x9   :  { %v445_v62 = vld [vmem:[%s1872_s8] sm:$0xff] }
   0xa   :  { %v1407_v0 = vpack.c.bf16 %v446_v63, %v445_v62  ;;  %v449_v4 = vld [vmem:[%s1872_s8 + $0x20] sm:$0xff] }
   0xb   :  { %1398 = vmatpush3.bf16.msra.mxu1 %v1395_v8  ;;  %v1415_v7 = vpack.c.bf16 %v450_v5, %v449_v4  ;;  %v452_v8 = vld [vmem:[%s1872_s8 + $0x38] sm:$0xff] }
  0xd8   :  { %v1291_v10 = vpop.f32.mrb[0].mxu0 }
  0xd9   :  { %v126_v11 = vpop.f32.mrb[1].mxu0  ;;  %v132_v13 = vadd.f32 %v1291_v10, %v1185_v9  ;;  %v1194_v10 = vld [vmem:[%s1871_s7] ss:$0 sm:$0xff] }
  0xda   :  { %v127_v12 = vadd.f32 %v1185_v9, %v126_v11  ;;  %v1419_v9 = vpack.c.bf16 %v452_v8, %v451_v6 }
  0xdc   :  { %1300 = vmatprep.mubr.msk.f32.mxu1 %vm139_vm1, %v127_v12 }
  0xdd   :  { %1301 = vmatmul.mubr.msk.f32.vlgmr.msra.gmra.mrb[0].mxu1 %vm139_vm1, %v132_v13 }
 0x1b0   :  { %v1302_v17 = vpop.f32.mrb[0].mxu1 }
 0x1b1   :  { %v212_v18 = vpop.f32.mrb[1].mxu1  ;;  %v229_v22 = vmul.f32 %v1302_v17, %v1190_v16 }
 0x1b2   :  { %v1400_v20 = vpack.c.bf16 %v1302_v17, %v212_v18  ;;  %v228_v21 = vmul.f32 %v1190_v16, %v212_v18 }
 0x1b3   :  { %v233_v24 = vsel %vm139_vm1, %v229_v22, 0.0 }
 0x1b4   :  { %1402 = vmatpush3.bf16.xpose.msk.msra.mxu0 %vm1668_vm3, %v1400_v20  ;;  %v230_v23 = vsel %vm139_vm1, %v228_v21, 0.0 }
 0x1b5   :  { %1404 = vmatprep.subr.bf16.mxu0 %v1400_v20  ;;  %231 = vadd.xlane.f32.xlu0 %v230_v23 }
 0x1b9   :  { %234 = vadd.xlane.f32.xlu0 %v233_v24 }
 0x1bb   :  { %1308 = vmatmul.mubr.msk.f32.vlgmr.msra.gmra.mrb[2].mxu0 %vm139_vm1, %v236_v25 }
 0x1bc   :  { %1406 = vmatpush3.bf16.msra.mxu0 %v1400_v20 }
 0x1bd   :  { %1408 = vmatprep.subr.bf16.mxu0 %v1407_v0 }
 0x242   :  { %v232_v28 = vpop.xlane.xlu0 %231 }
 0x246   :  { %v235_v33 = vpop.xlane.xlu0 %234 }
 0x28e   :  { %v312_v30 = vpop.f32.mrb[2].mxu0 }
 0x28f   :  { %v319_v31 = vrot.slane %v312_v30, %v318_v29  ;;  %v1309_v32 = vpop.f32.mrb[3].mxu0 }
 0x291   :  { %v320_v34 = vadd.f32 %v319_v31, %v232_v28  ;;  %v321_v35 = vadd.f32 %v319_v31, %v235_v33 }
 0x293   :  { %v324_v37 = vmul.f32 0.2, %v320_v34  ;;  %v325_v38 = vmul.f32 0.2, %v321_v35  ;;  %vm322_vm4 = vcmp.gt.f32.partialorder %v320_v34, 0.0  ;;  %vm323_vm5 = vcmp.gt.f32.partialorder %v321_v35, 0.0 }
 0x295   :  { %v326_v39 = vsel %vm322_vm4, %v320_v34, %v324_v37  ;;  %v327_v41 = vsel %vm323_vm5, %v321_v35, %v325_v38 }
 0x296   :  { %v328_v42 = vadd.f32 %v326_v39, %v1688_v36  ;;  %v329_v44 = vadd.f32 %v327_v41, %v1693_v40 }
 0x298   :  { %v331_v43 = vsel %vm330_vm6, %v328_v42, -inf  ;;  %v334_v45 = vsel %vm330_vm6, %v329_v44, -inf }
 0x299   :  { %332 = vmax.xlane.f32.xlu1 %v331_v43 }
 0x29d   :  { %335 = vmax.xlane.f32.xlu1 %v334_v45 }
 0x326   :  { %v333_v46 = vpop.xlane.xlu1 %332 }
 0x327   :  { %v337_v47 = vsub.f32 %v328_v42, %v333_v46 }
 0x329   :  { %v339_v48 = vmul.f32 1.442695, %v337_v47 }
 0x32a   :  { %v336_v49 = vpop.xlane.xlu1 %335 }
 0x32b   :  { %1472 = vpow2.f32 %v339_v48  ;;  %v338_v50 = vsub.f32 %v329_v44, %v336_v49  ;;  %v1201_v48 = vld [vmem:[%s1868_s4 + $0x20] sm:$0xff]  ;;  %v1202_v49 = vld [vmem:[%s1868_s4 + $0x28] sm:$0xff] }
 0x32d   :  { %v341_v51 = vmul.f32 1.442695, %v338_v50  ;;  %v1423_v50 = vpack.c.bf16 %v1202_v49, %v1201_v48  ;;  %v1223_v49 = vld [vmem:[%s1872_s8 + $0x70] sm:$0xff] }
 0x32f   :  { %1474 = vpow2.f32 %v341_v51  ;;  %1424 = vmatprep.subr.bf16.mxu1 %v1423_v50 }
 0x330   :  { %1426 = vmatpush3.bf16.msra.mxu1 %v1423_v50  ;;  %v1224_v50 = vld [vmem:[%s1872_s8 + $0x78] sm:$0xff] }
 0x335   :  { %v1473_v52 = vpop.eup %1472 }
 0x336   :  { %v343_v53 = vsel %vm330_vm6, %v1473_v52, 0.0 }
 0x337   :  { %344 = vadd.xlane.f32.xlu0 %v343_v53  ;;  %v1203_v53 = vld [vmem:[%s1868_s4 + $0x30] sm:$0xff] }
 0x339   :  { %v1475_v54 = vpop.eup %1474 }
 0x33a   :  { %v346_v55 = vsel %vm330_vm6, %v1475_v54, 0.0 }
 0x33b   :  { %347 = vadd.xlane.f32.xlu1 %v346_v55 }
 0x3c4   :  { %v345_v56 = vpop.xlane.xlu0 %344 }
 0x3c5   :  { %1476 = vrcp.f32 %v345_v56 }
 0x3c8   :  { %v348_v57 = vpop.xlane.xlu1 %347 }
 0x3c9   :  { %1478 = vrcp.f32 %v348_v57 }
 0x3cf   :  { %v1477_v58 = vpop.eup %1476 }
 0x3d0   :  { %v351_v59 = vmul.f32 %v1477_v58, %v1473_v52 }
 0x3d2   :  { %1314 = vmatprep.mubr.msk.f32.mxu0 %vm330_vm6, %v351_v59 }
 0x3d3   :  { %v1479_v60 = vpop.eup %1478 }
 0x3d4   :  { %v352_v61 = vmul.f32 %v1479_v60, %v1475_v54  ;;  %v1204_v54 = vld [vmem:[%s1868_s4 + $0x38] sm:$0xff] }
 0x3d5   :  { %v1427_v55 = vpack.c.bf16 %v1204_v54, %v1203_v53 }
 0x3d6   :  { %1315 = vmatmul.mubr.msk.f32.vlgmr.msra.gmra.mrb[4].mxu0 %vm330_vm6, %v352_v61 }
 0x3d7   :  { %1410 = vmatpush3.bf16.msra.mxu0 %v1407_v0  ;;  %1428 = vmatprep.subr.bf16.mxu1 %v1427_v55 }
 0x3d8   :  { %1412 = vmatprep.subr.bf16.mxu0 %v1411_v3  ;;  %1430 = vmatpush3.bf16.msra.mxu1 %v1427_v55 }
 0x3d9   :  { %1431 = vmatprep.subr.bf16.mxu1 %v1560_v14  ;;  %v1208_v14 = vld [vmem:[%s1869_s5 + $0x1] ss:$0 sm:$0xff]  ;;  %s1565_s5 = smov 96  }
 0x3db   :  { %1414 = vmatpush3.bf16.msra.mxu0 %v1411_v3 }
 0x3dc   :  { %1416 = vmatprep.subr.bf16.mxu0 %v1415_v7 }
 0x3df   :  { %1418 = vmatpush3.bf16.msra.mxu0 %v1415_v7 }
 0x3e0   :  { %1420 = vmatprep.subr.bf16.mxu0 %v1419_v9 }
 0x3e3   :  { %1422 = vmatpush3.bf16.msra.mxu0 %v1419_v9 }
 0x4a9   :  { %v1316_v11 = vpop.f32.mrb[4].mxu0 }
 0x4aa   :  { %v438_v12 = vadd.f32 %v1316_v11, %v1194_v10  ;;  %v432_v13 = vpop.f32.mrb[5].mxu0 }
 0x4ab   :  { %v433_v16 = vadd.f32 %v1194_v10, %v432_v13 }
 0x4ac   :  { %1480 = vtanh.f32 %v438_v12 }
 0x4ad   :  { %1482 = vtanh.f32 %v433_v16 }
 0x4b6   :  { %v1481_v17 = vpop.eup %1480 }
 0x4b7   :  { %v1483_v18 = vpop.eup %1482  ;;  %v444_v21 = vsel %vm139_vm1, %v1481_v17, 0.0 }
 0x4b8   :  { %v443_v20 = vsel %vm139_vm1, %v1483_v18, 0.0 }
 0x4b9   :  { %1333 = vmatprep.mubr.msk.f32.mxu0 %vm453_vm7, %v443_v20 }
 0x4ba   :  { %1334 = vmatmul.mubr.msk.f32.vlgmr.msra.gmra.mrb[6].mxu0 %vm453_vm7, %v444_v21 }
 0x58d   :  { %v1335_v22 = vpop.f32.mrb[6].mxu0 }
 0x58e   :  { %1484 = vtanh.f32 %v1335_v22  ;;  %v526_v23 = vpop.f32.mrb[7].mxu0  ;;  %v1200_v28 = vmul.f32 -1.442695, %v1335_v22 }
 0x58f   :  { %1486 = vtanh.f32 %v526_v23  ;;  %v1199_v26 = vmul.f32 -1.442695, %v526_v23 }
 0x591   :  { %1488 = vpow2.f32 %v1199_v26 }
 0x592   :  { %1490 = vpow2.f32 %v1200_v28 }
 0x598   :  { %v1485_v24 = vpop.eup %1484 }
 0x599   :  { %v1487_v25 = vpop.eup %1486  ;;  %555 = vrot.lane.b32.xlu1 %v1485_v24, %s1563_s20 }
 0x59a   :  { %553 = vrot.lane.b32.xlu0 %v1487_v25, %s1563_s20 }
 0x59b   :  { %v1489_v30 = vpop.eup %1488 }
 0x59c   :  { %v541_v31 = vadd.f32 1.0, %v1489_v30  ;;  %v1491_v32 = vpop.eup %1490 }
 0x59d   :  { %v542_v33 = vadd.f32 1.0, %v1491_v32 }
 0x59e   :  { %1492 = vrcp.f32 %v541_v31 }
 0x59f   :  { %1494 = vrcp.f32 %v542_v33 }
 0x5a8   :  { %v1493_v34 = vpop.eup %1492 }
 0x5a9   :  { %v1495_v39 = vpop.eup %1494  ;;  %v549_v42 = vmul.f32 0.0, %v1493_v34 }
 0x5aa   :  { %v550_v45 = vmul.f32 0.0, %v1495_v39 }
 0x60b   :  { %v556_v38 = vpop.permute.xlu1 %555 }
 0x60c   :  { %v554_v35 = vpop.permute.xlu0 %553  ;;  %v560_v41 = vmul.f32 %v1495_v39, %v556_v38  ;;  %v1218_v38 = vld [vmem:[%s1872_s8 + $0x48] sm:$0xff] }
 0x60d   :  { %v559_v37 = vmul.f32 %v1493_v34, %v554_v35 }
 0x60f   :  { %563 = vrot.lane.b32.xlu1 %v559_v37, %s1563_s20  ;;  %v1217_v37 = vld [vmem:[%s1872_s8 + $0x40] sm:$0xff] }
 0x613   :  { %565 = vrot.lane.b32.xlu1 %v560_v41, %s1563_s20  ;;  %v1219_v41 = vld [vmem:[%s1872_s8 + $0x50] sm:$0xff] }
 0x681   :  { %v564_v43 = vpop.permute.xlu1 %563 }
 0x682   :  { %v1738_v44 = vadd.f32 %v564_v43, %v549_v42  ;;  %v1220_v42 = vld [vmem:[%s1872_s8 + $0x58] sm:$0xff] }
 0x683   :  { %v1443_v43 = vpack.c.bf16 %v1220_v42, %v1219_v41 }
 0x684   :  { %1496 = vtanh.f32 %v1738_v44 }
 0x685   :  { %v566_v46 = vpop.permute.xlu1 %565 }
 0x686   :  { %v1741_v47 = vadd.f32 %v566_v46, %v550_v45  ;;  %v1221_v45 = vld [vmem:[%s1872_s8 + $0x60] sm:$0xff]  ;;  %v1222_v46 = vld [vmem:[%s1872_s8 + $0x68] sm:$0xff] }
 0x687   :  { %v1447_v48 = vpack.c.bf16 %v1222_v46, %v1221_v45 }
 0x688   :  { %1498 = vtanh.f32 %v1741_v47 }
 0x68e   :  { %v1497_v51 = vpop.eup %1496 }
 0x68f   :  { %575 = vrot.lane.b32.xlu0 %v1497_v51, %s1563_s20  ;;  %v1451_v51 = vpack.c.bf16 %v1224_v50, %v1223_v49 }
 0x692   :  { %v1499_v52 = vpop.eup %1498 }
 0x693   :  { %577 = vrot.lane.b32.xlu1 %v1499_v52, %s1563_s20  ;;  %v1214_v52 = vld [vmem:[%s1871_s7 + $0x1] ss:$0 sm:$0xff] }
 0x701   :  { %v576_v56 = vpop.permute.xlu0 %575 }
 0x702   :  { %v581_v57 = vmul.f32 %v1493_v34, %v576_v56 }
 0x704   :  { %590 = vrot.lane.b32.xlu0 %v581_v57, %s1564_s28 }
 0x705   :  { %v578_v58 = vpop.permute.xlu1 %577 }
 0x706   :  { %v582_v59 = vmul.f32 %v1495_v39, %v578_v58  ;;  %v1439_v39 = vpack.c.bf16 %v1218_v38, %v1217_v37 }
 0x708   :  { %592 = vrot.lane.b32.xlu1 %v582_v59, %s1564_s28 }
 0x776   :  { %v591_v60 = vpop.permute.xlu0 %590 }
 0x777   :  { %1344 = vmatprep.mubr.msk.f32.mxu1 %vm139_vm1, %v591_v60 }
 0x77a   :  { %v593_v61 = vpop.permute.xlu1 %592 }
 0x77b   :  { %1345 = vmatmul.mubr.msk.f32.vlgmr.msra.gmra.mrb[2].mxu1 %vm139_vm1, %v593_v61 }
 0x77c   :  { %1351 = vmatprep.mubr.msk.f32.mxu1 %vm1561_vm2, %v1562_v15  ;;  %v1209_v15 = vld [vmem:[%s1870_s6 + $0x1] sm:$0x1] }
 0x84e   :  { %v1346_v62 = vpop.f32.mrb[2].mxu1 }
 0x84f   :  { %v682_v63 = vmul.f32 %v1346_v62, %v1208_v14  ;;  %v664_v0 = vpop.f32.mrb[3].mxu1 }
 0x850   :  { %v681_v1 = vmul.f32 %v1208_v14, %v664_v0  ;;  %v1432_v2 = vpack.c.bf16 %v1346_v62, %v664_v0 }
 0x851   :  { %v686_v3 = vsel %vm139_vm1, %v682_v63, 0.0 }
 0x852   :  { %687 = vadd.xlane.f32.xlu1 %v686_v3  ;;  %1434 = vmatpush3.bf16.xpose.msk.msra.mxu1 %vm1668_vm3, %v1432_v2  ;;  %v683_v4 = vsel %vm139_vm1, %v681_v1, 0.0 }
 0x853   :  { %1436 = vmatprep.subr.bf16.mxu0 %v1432_v2  ;;  %684 = vadd.xlane.f32.xlu0 %v683_v4 }
 0x854   :  { %1438 = vmatpush3.bf16.msra.mxu0 %v1432_v2  ;;  %1440 = vmatprep.subr.bf16.mxu1 %v1439_v39 }
 0x859   :  { %1352 = vmatmul.mubr.msk.f32.vlgmr.msra.gmra.mrb[4].mxu1 %vm139_vm1, %v1209_v15 }
 0x85a   :  { %1442 = vmatpush3.bf16.msra.mxu1 %v1439_v39 }
 0x85b   :  { %1444 = vmatprep.subr.bf16.mxu1 %v1443_v43 }
 0x85e   :  { %1446 = vmatpush3.bf16.msra.mxu1 %v1443_v43 }
 0x85f   :  { %1448 = vmatprep.subr.bf16.mxu1 %v1447_v48 }
 0x862   :  { %1450 = vmatpush3.bf16.msra.mxu1 %v1447_v48 }
 0x863   :  { %1452 = vmatprep.subr.bf16.mxu1 %v1451_v51 }
 0x866   :  { %1454 = vmatpush3.bf16.msra.mxu1 %v1451_v51 }
 0x8df   :  { %v688_v8 = vpop.xlane.xlu1 %687 }
 0x8e0   :  { %v685_v9 = vpop.xlane.xlu0 %684 }
 0x92c   :  { %v766_v5 = vpop.f32.mrb[4].mxu1 }
 0x92d   :  { %v773_v6 = vrot.slane %v766_v5, %v318_v29  ;;  %v1353_v7 = vpop.f32.mrb[5].mxu1 }
 0x92f   :  { %v774_v19 = vadd.f32 %v773_v6, %v685_v9  ;;  %v775_v10 = vadd.f32 %v773_v6, %v688_v8 }
 0x931   :  { %v778_v11 = vmul.f32 0.2, %v774_v19  ;;  %v779_v12 = vmul.f32 0.2, %v775_v10  ;;  %vm776_vm8 = vcmp.gt.f32.partialorder %v774_v19, 0.0  ;;  %vm777_vm9 = vcmp.gt.f32.partialorder %v775_v10, 0.0 }
 0x933   :  { %v780_v13 = vsel %vm776_vm8, %v774_v19, %v778_v11  ;;  %v781_v16 = vsel %vm777_vm9, %v775_v10, %v779_v12 }
 0x934   :  { %v782_v17 = vadd.f32 %v780_v13, %v1688_v36  ;;  %v783_v20 = vadd.f32 %v781_v16, %v1693_v40 }
 0x936   :  { %v784_v18 = vsel %vm330_vm6, %v782_v17, -inf  ;;  %v787_v27 = vsel %vm330_vm6, %v783_v20, -inf }
 0x937   :  { %785 = vmax.xlane.f32.xlu0 %v784_v18 }
 0x93b   :  { %788 = vmax.xlane.f32.xlu0 %v787_v27  ;;  %v1053_v27 = vld [vmem:[%s1873_s9] sm:$0xff] }
 0x9c4   :  { %v786_v29 = vpop.xlane.xlu0 %785 }
 0x9c5   :  { %v790_v21 = vsub.f32 %v782_v17, %v786_v29  ;;  %v1054_v29 = vld [vmem:[%s1873_s9 + $0x8] sm:$0xff] }
 0x9c7   :  { %v792_v22 = vmul.f32 1.442695, %v790_v21  ;;  %v1455_v21 = vpack.c.bf16 %v1054_v29, %v1053_v27 }
 0x9c8   :  { %v789_v23 = vpop.xlane.xlu0 %788 }
 0x9c9   :  { %1500 = vpow2.f32 %v792_v22  ;;  %v791_v24 = vsub.f32 %v783_v20, %v789_v23  ;;  %1456 = vmatprep.subr.bf16.mxu0 %v1455_v21  ;;  %v1056_v23 = vld [vmem:[%s1873_s9 + $0x18] sm:$0xff] }
 0x9cb   :  { %v794_v25 = vmul.f32 1.442695, %v791_v24 }
 0x9cd   :  { %1502 = vpow2.f32 %v794_v25 }
 0x9d3   :  { %v1501_v26 = vpop.eup %1500 }
 0x9d4   :  { %v796_v28 = vsel %vm330_vm6, %v1501_v26, 0.0 }
 0x9d5   :  { %797 = vadd.xlane.f32.xlu0 %v796_v28 }
 0x9d7   :  { %v1503_v36 = vpop.eup %1502 }
 0x9d8   :  { %v799_v30 = vsel %vm330_vm6, %v1503_v36, 0.0 }
 0x9d9   :  { %800 = vadd.xlane.f32.xlu1 %v799_v30 }
 0x9ea   :  { %899 = vrot.lane.b32.xlu1 %v582_v59, %s1565_s5 }
 0x9eb   :  { %897 = vrot.lane.b32.xlu0 %v581_v57, %s1565_s5 }
 0xa62   :  { %v798_v40 = vpop.xlane.xlu0 %797 }
 0xa63   :  { %1504 = vrcp.f32 %v798_v40 }
 0xa66   :  { %v801_v31 = vpop.xlane.xlu1 %800  ;;  %v898_v59 = vpop.permute.xlu0 %897 }
 0xa67   :  { %1506 = vrcp.f32 %v801_v31  ;;  %v1229_v31 = vld [vmem:[%s1874_s10] ss:$0 sm:$0xff] }
 0xa6a   :  { %v900_v60 = vpop.permute.xlu1 %899 }
 0xa6d   :  { %v1505_v32 = vpop.eup %1504 }
 0xa6e   :  { %v804_v33 = vmul.f32 %v1505_v32, %v1501_v26 }
 0xa70   :  { %1358 = vmatprep.mubr.msk.f32.mxu0 %vm330_vm6, %v804_v33 }
 0xa71   :  { %v1507_v34 = vpop.eup %1506 }
 0xa72   :  { %v805_v35 = vmul.f32 %v1507_v34, %v1503_v36 }
 0xa74   :  { %1359 = vmatmul.mubr.msk.f32.vlgmr.msra.gmra.mrb[8].mxu0 %vm330_vm6, %v805_v35 }
 0xa75   :  { %1458 = vmatpush3.bf16.msra.mxu0 %v1455_v21 }
 0xb47   :  { %v1360_v53 = vpop.f32.mrb[8].mxu0 }
 0xb48   :  { %v892_v54 = vadd.f32 %v1360_v53, %v1214_v52  ;;  %v886_v55 = vpop.f32.mrb[9].mxu0 }
 0xb49   :  { %v887_v56 = vadd.f32 %v1214_v52, %v886_v55 }
 0xb4a   :  { %1508 = vtanh.f32 %v892_v54 }
 0xb4b   :  { %1510 = vtanh.f32 %v887_v56 }
 0xb54   :  { %v1509_v57 = vpop.eup %1508 }
 0xb55   :  { %v1511_v58 = vpop.eup %1510  ;;  %v904_v14 = vsel %vm139_vm1, %v1509_v57, %v900_v60 }
 0xb56   :  { %v903_v61 = vsel %vm139_vm1, %v1511_v58, %v898_v59 }
 0xb57   :  { %1377 = vmatprep.mubr.msk.f32.mxu1 %vm453_vm7, %v903_v61 }
 0xb58   :  { %1378 = vmatmul.mubr.msk.f32.vlgmr.msra.gmra.mrb[6].mxu1 %vm453_vm7, %v904_v14 }
 0xc2b   :  { %v1379_v62 = vpop.f32.mrb[6].mxu1 }
 0xc2c   :  { %v986_v63 = vpop.f32.mrb[7].mxu1  ;;  %v1228_v3 = vmul.f32 -1.442695, %v1379_v62 }
 0xc2d   :  { %1512 = vtanh.f32 %v986_v63  ;;  %v1227_v2 = vmul.f32 -1.442695, %v986_v63 }
 0xc2e   :  { %1514 = vtanh.f32 %v1379_v62 }
 0xc2f   :  { %1516 = vpow2.f32 %v1227_v2 }
 0xc30   :  { %1518 = vpow2.f32 %v1228_v3 }
 0xc37   :  { %v1513_v0 = vpop.eup %1512 }
 0xc38   :  { %1013 = vrot.lane.b32.xlu1 %v1513_v0, %s1563_s20  ;;  %v1515_v1 = vpop.eup %1514 }
 0xc39   :  { %v1517_v4 = vpop.eup %1516 }
 0xc3a   :  { %v1001_v15 = vadd.f32 1.0, %v1517_v4  ;;  %v1519_v5 = vpop.eup %1518 }
 0xc3b   :  { %v1002_v6 = vadd.f32 1.0, %v1519_v5 }
 0xc3c   :  { %1015 = vrot.lane.b32.xlu1 %v1515_v1, %s1563_s20  ;;  %1520 = vrcp.f32 %v1001_v15 }
 0xc3d   :  { %1522 = vrcp.f32 %v1002_v6 }
 0xc46   :  { %v1521_v7 = vpop.eup %1520 }
 0xc47   :  { %v1523_v19 = vpop.eup %1522  ;;  %v1009_v12 = vmul.f32 %v1521_v7, %v1738_v44 }
 0xc48   :  { %v1010_v17 = vmul.f32 %v1523_v19, %v1741_v47  ;;  %v1055_v47 = vld [vmem:[%s1873_s9 + $0x10] sm:$0xff] }
 0xc49   :  { %v1459_v24 = vpack.c.bf16 %v1056_v23, %v1055_v47 }
 0xc4b   :  { %1460 = vmatprep.subr.bf16.mxu0 %v1459_v24 }
 0xc4c   :  { %1462 = vmatpush3.bf16.msra.mxu0 %v1459_v24 }
 0xcaa   :  { %v1014_v8 = vpop.permute.xlu1 %1013 }
 0xcab   :  { %v1019_v9 = vmul.f32 %v1521_v7, %v1014_v8 }
 0xcad   :  { %1023 = vrot.lane.b32.xlu0 %v1019_v9, %s1563_s20 }
 0xcae   :  { %v1016_v10 = vpop.permute.xlu1 %1015 }
 0xcaf   :  { %v1020_v11 = vmul.f32 %v1523_v19, %v1016_v10 }
 0xcb1   :  { %1025 = vrot.lane.b32.xlu1 %v1020_v11, %s1563_s20 }
 0xd1f   :  { %v1024_v13 = vpop.permute.xlu0 %1023 }
 0xd20   :  { %v1029_v16 = vadd.f32 %v1024_v13, %v1009_v12 }
 0xd22   :  { %1524 = vtanh.f32 %v1029_v16 }
 0xd23   :  { %v1026_v18 = vpop.permute.xlu1 %1025 }
 0xd24   :  { %v1030_v20 = vadd.f32 %v1026_v18, %v1010_v17 }
 0xd26   :  { %1526 = vtanh.f32 %v1030_v20 }
 0xd2c   :  { %v1525_v44 = vpop.eup %1524 }
 0xd2d   :  { %1035 = vrot.lane.b32.xlu0 %v1525_v44, %s1563_s20 }
 0xd30   :  { %v1527_v22 = vpop.eup %1526 }
 0xd31   :  { %1037 = vrot.lane.b32.xlu1 %v1527_v22, %s1563_s20 }
 0xd9f   :  { %v1036_v25 = vpop.permute.xlu0 %1035 }
 0xda0   :  { %v1041_v26 = vmul.f32 %v1521_v7, %v1036_v25 }
 0xda2   :  { %1045 = vrot.lane.b32.xlu0 %v1041_v26, %s1564_s28 }
 0xda3   :  { %v1038_v28 = vpop.permute.xlu1 %1037 }
 0xda4   :  { %v1042_v36 = vmul.f32 %v1523_v19, %v1038_v28 }
 0xda6   :  { %1047 = vrot.lane.b32.xlu1 %v1042_v36, %s1564_s28  ;;  %s1566_s28 = smov [#allocation2]  }
 0xda7   :  { %s1170_s10 = sshll.u32 %s1566_s28, 4  ;;  %s1171_s10 = int_to_ptr.vmem [resolvable:$true] %s1170_s10 }
 0xda8   :  { %s1536_s13 = scalar_lea.vmem %s1171_s10, 256  ;;  %p1541_p1 = scmp.lt.s32.totalorder %s1171_s10, %s1171_s10 }
 0xda9   :  { %p1537_p0 = scmp.ne.s32.totalorder %s1171_s10, %s1536_s13  ;;  %p1542_p2 = scmp.lt.s32.totalorder %s1536_s13, %s1536_s13 }
 0xdab   :  { %p1543_p3 = por %p1542_p2, %p1541_p1 }
 0xdad   :  { %p1544_p4 = pnand %p1543_p3, %p1537_p0 }
 0xe14   :  { %v1046_v30 = vpop.permute.xlu0 %1045 }
 0xe15   :  { %1051 = vst.msk [vmem:[#allocation2] sm:$0xff] %vm139_vm1, %v1046_v30  ;;  %1388 = vmatprep.mubr.msk.f32.mxu0 %vm139_vm1, %v1046_v30 }
 0xe18   :  { %v1048_v40 = vpop.permute.xlu1 %1047 }
 0xe19   :  { %1052 = vst.msk [vmem:[#allocation2 + $0x8] sm:$0xff] %vm139_vm1, %v1048_v40  ;;  %1389 = vmatmul.mubr.msk.f32.vlgmr.msra.gmra.mrb[10].mxu0 %vm139_vm1, %v1048_v40 }
 0xeec   :  { %v1390_v32 = vpop.f32.mrb[10].mxu0 }
 0xeed   :  { %v1140_v33 = vadd.f32 %v1390_v32, %v1229_v31  ;;  %v1134_v34 = vpop.f32.mrb[11].mxu0 }
 0xeee   :  { %v1135_v35 = vadd.f32 %v1229_v31, %v1134_v34 }
 0xeef   :  { %1145 = vmax.xlane.f32.xlu1 %v1140_v33 }
 0xef0   :  { %1143 = vmax.xlane.f32.xlu0 %v1135_v35 }
 0xf7c   :  { %v1146_v37 = vpop.xlane.xlu1 %1145 }
 0xf7d   :  { %v1144_v38 = vpop.xlane.xlu0 %1143  ;;  %v1148_v39 = vsub.f32 %v1140_v33, %v1146_v37 }
 0xf7e   :  { %v1147_v41 = vsub.f32 %v1135_v35, %v1144_v38 }
 0xf7f   :  { %v1151_v43 = vmul.f32 1.442695, %v1148_v39 }
 0xf80   :  { %v1149_v42 = vmul.f32 1.442695, %v1147_v41 }
 0xf82   :  { %1528 = vpow2.f32 %v1149_v42 }
 0xf83   :  { %1530 = vpow2.f32 %v1151_v43 }
 0xf8c   :  { %v1529_v45 = vpop.eup %1528 }
 0xf8d   :  { %1153 = vadd.xlane.f32.xlu0 %v1529_v45  ;;  %v1531_v46 = vpop.eup %1530 }
 0xf91   :  { %1155 = vadd.xlane.f32.xlu0 %v1531_v46 }
 0xf92   :  { %1547 = shalt.err (!%p1544_p4)
}
 0xf93   :  { %s1548_s15 = scalar_lea.hbm %s1875_s11, 256 }
 0xf94   :  { %p1549_p5 = scmp.ne.s32.totalorder %s1875_s11, %s1548_s15  ;;  %p1552_p6 = scmp.lt.u32.totalorder %s1548_s15, %s1875_s11 }
 0xf96   :  { %p1554_p7 = pnand %p1552_p6, %p1549_p5 }
 0xf98   :  { %1557 = shalt.err (!%p1554_p7)
}
 0xf99   :  { %s1567_s19 = smov 128   ;;  %s1568_s21 = smov 8  }
 0xf9a   :  { %1176 = dma.vmem_to_hbm [thread:$0]  %s1171_s10, 256, %s1875_s11, [#allocation3], %s1567_s19, %s1567_s19, %s1568_s21  }
0x101a   :  { %v1154_v48 = vpop.xlane.xlu0 %1153 }
0x101b   :  { %1532 = vlog2.f32 %v1154_v48 }
0x101e   :  { %v1156_v49 = vpop.xlane.xlu0 %1155 }
0x101f   :  { %1534 = vlog2.f32 %v1156_v49 }
0x1025   :  { %v1533_v50 = vpop.eup %1532 }
0x1026   :  { %v1158_v51 = vmul.f32 0.6931472, %v1533_v50 }
0x1028   :  { %v1161_v52 = vsub.f32 %v1147_v41, %v1158_v51 }
0x1029   :  { %v1535_v53 = vpop.eup %1534 }
0x102a   :  { %1163 = vst [vmem:[%s1876_s12] sm:$0xff] %v1161_v52  ;;  %v1160_v54 = vmul.f32 0.6931472, %v1535_v53 }
0x102c   :  { %v1162_v55 = vsub.f32 %v1148_v39, %v1160_v54 }
0x102e   :  { %1164 = vst [vmem:[%s1876_s12 + $0x8] sm:$0xff] %v1162_v55 }
0x102f   :  { %1558 = dma.done.wait [#allocation3], 256  }
0x1030   :  { %1559 = vsyncadd [#allocation3], 4294967040 }
0x1031   :  { %1184 = vsyncpa [#allocation3], 1 }

</bundles_post_ra>
